<compile_context>
chip_gen: v7x
topology: tpu7x:2x2x1
jax: 0.10.0
libtpu: 0.0.40
codegen_flags: <defaults>
</compile_context>

<pallas_src>
import jax
import jax.numpy as jnp
from jax import lax
from jax.experimental import pallas as pl
from jax.experimental.pallas import tpu as pltpu


_NBUF = 32                      # in-flight HBM->HBM row copies (DMA semaphore ring depth)
_UNROLL = 8                     # rows handled per visible loop iteration
_MAX_TILE_N = 1024              # tokens per grid step
_VMEM_TABLE_LIMIT = 8 << 20     # fast path if the stacked table is <= 8 MiB (v7x-safe)
_OUT_BUF_BUDGET = 8 << 20       # VMEM budget for the double-buffered output block (fast path)


def _round_up(x, m):
    return (x + m - 1) // m * m


def _make_vmem_gather_kernel(vocab, tile_n):
    """Fast path: gather rows of a VMEM-resident table with dynamic vector loads."""
    assert tile_n % _UNROLL == 0

    def kernel(ids_ref, w_ref, o_ref):
        # ids_ref: (n_pad,) int32 token ids in SMEM (scalar prefetch)
        # w_ref:   (vocab, n_head*n_embd) table block; same block every grid step -> it is
        #          DMA'd into VMEM once and stays resident.
        # o_ref:   (tile_n, n_head*n_embd) output block.
        base = pl.program_id(0) * tile_n

        def body(i, carry):
            rows = []
            for u in range(_UNROLL):
                tok = ids_ref[base + i * _UNROLL + u]
                tok = jnp.minimum(jnp.maximum(tok, 0), vocab - 1)
                rows.append(w_ref[pl.ds(tok, 1), :])
            r0 = pl.multiple_of(i * _UNROLL, _UNROLL)       # aligned, unmasked 8-row store
            o_ref[pl.ds(r0, _UNROLL), :] = jnp.concatenate(rows, axis=0)
            return carry

        lax.fori_loop(0, tile_n // _UNROLL, body, 0)

    return kernel


def _make_dma_gather_kernel(vocab, n_tokens, tile_n, nbuf):
    """Large-table path: direct HBM->HBM row gather, one DMA per token (all heads at once)."""
    assert nbuf <= tile_n and (tile_n - nbuf) % _UNROLL == 0

    def kernel(ids_ref, w_hbm, o_hbm, sems):
        # ids_ref: (n_tokens,) int32 token ids in SMEM (scalar prefetch)
        # w_hbm:   (vocab, n_head*n_embd) table left in HBM (pl.ANY)
        # o_hbm:   (n_tokens, n_head*n_embd) output left in HBM (pl.ANY)
        # sems:    (nbuf,) DMA completion semaphores
        base = pl.program_id(0) * tile_n
        last = n_tokens - 1

        def desc(src_row, dst_row, slot):
            return pltpu.make_async_copy(
                w_hbm.at[pl.ds(src_row, 1), :],
                o_hbm.at[pl.ds(dst_row, 1), :],
                sems.at[slot])

        def issue(t):
            # Ragged last tile: clamp to the last valid token; the duplicate copies carry
            # identical payload, so completion order does not matter and nothing goes OOB.
            idx = jnp.minimum(base + t, last)
            tok = ids_ref[idx]
            tok = jnp.minimum(jnp.maximum(tok, 0), vocab - 1)
            desc(tok, idx, t % nbuf).start()

        def retire(slot):
            # wait() only needs the semaphore and the (constant) transfer size.
            desc(0, 0, slot).wait()

        # Prime the ring (static trip count -> unrolled at trace time).
        for t in range(nbuf):
            issue(t)

        # Steady state, 8x unrolled: read the id from SMEM *before* the wait (.wait()
        # breaks SMEM sst->sld forwarding), retire the copy that used this slot nbuf
        # steps ago, then reuse the slot for the new row.
        def body(i, carry):
            for u in range(_UNROLL):
                t = nbuf + i * _UNROLL + u
                idx = jnp.minimum(base + t, last)
                tok = ids_ref[idx]
                tok = jnp.minimum(jnp.maximum(tok, 0), vocab - 1)
                retire(t % nbuf)
                desc(tok, idx, t % nbuf).start()
            return carry

        lax.fori_loop(0, (tile_n - nbuf) // _UNROLL, body, 0)

        # Drain the last nbuf in-flight copies before the grid step ends.
        for t in range(tile_n - nbuf, tile_n):
            retire(t % nbuf)

    return kernel


def _gather_rows_vmem(ids, w2d, n_tokens):
    """ids: (N,) int32; w2d: (vocab, n_head*n_embd).  Returns (N, n_head*n_embd)."""
    vocab, row = w2d.shape
    row_bytes = row * w2d.dtype.itemsize
    cap = max(_UNROLL, (_OUT_BUF_BUDGET // (2 * row_bytes)) // _UNROLL * _UNROLL)
    tile_n = min(_MAX_TILE_N, cap, _round_up(n_tokens, _UNROLL))
    tile_n = max(_UNROLL, tile_n // _UNROLL * _UNROLL)
    n_pad = _round_up(n_tokens, tile_n)
    if n_pad != n_tokens:
        ids = jnp.concatenate([ids, jnp.zeros((n_pad - n_tokens,), jnp.int32)])
    n_tiles = n_pad // tile_n

    bytes_accessed = vocab * row_bytes + n_pad * row_bytes + n_pad * 4

    slab = pl.pallas_call(
        _make_vmem_gather_kernel(vocab, tile_n),
        out_shape=jax.ShapeDtypeStruct((n_pad, row), w2d.dtype),
        grid_spec=pltpu.PrefetchScalarGridSpec(
            num_scalar_prefetch=1,                            # token ids -> SMEM
            grid=(n_tiles,),
            in_specs=[pl.BlockSpec((vocab, row), lambda t, ids_ref: (0, 0))],
            out_specs=pl.BlockSpec((tile_n, row), lambda t, ids_ref: (t, 0)),
        ),
        compiler_params=pltpu.CompilerParams(
            dimension_semantics=("parallel",),
            vmem_limit_bytes=48 * 1024 * 1024),
        cost_estimate=pl.CostEstimate(flops=0, transcendentals=0,
                                      bytes_accessed=int(bytes_accessed)),
    )(ids, w2d)
    return slab[:n_tokens]


def _gather_rows_dma(ids, w2d):
    """ids: (N,) int32; w2d: (vocab, n_head*n_embd) kept in HBM.  Returns (N, row)."""
    (n_tokens,) = ids.shape
    vocab, row = w2d.shape
    tile_n = max(_UNROLL, min(_MAX_TILE_N, _round_up(n_tokens, _UNROLL)))
    nbuf = min(_NBUF, tile_n)
    n_tiles = pl.cdiv(n_tokens, tile_n)

    # TODO(synk): for very large n_tokens (>~250K) the scalar-prefetched id array may exceed
    # the SMEM budget; stream ids per tile from HBM instead of prefetching them all.
    itemsize = w2d.dtype.itemsize
    bytes_accessed = 2 * n_tokens * row * itemsize + n_tokens * 4

    return pl.pallas_call(
        _make_dma_gather_kernel(vocab, n_tokens, tile_n, nbuf),
        out_shape=jax.ShapeDtypeStruct((n_tokens, row), w2d.dtype),
        grid_spec=pltpu.PrefetchScalarGridSpec(
            num_scalar_prefetch=1,                            # token ids -> SMEM
            grid=(n_tiles,),
            in_specs=[pl.BlockSpec(memory_space=pl.ANY)],     # table stays in HBM
            out_specs=pl.BlockSpec(memory_space=pl.ANY),      # direct HBM destination
            scratch_shapes=[pltpu.SemaphoreType.DMA((nbuf,))],
        ),
        compiler_params=pltpu.CompilerParams(
            dimension_semantics=("parallel",),
            vmem_limit_bytes=32 * 1024 * 1024),
        cost_estimate=pl.CostEstimate(flops=0, transcendentals=0,
                                      bytes_accessed=int(bytes_accessed)),
    )(ids, w2d)


@jax.jit
def _value_embedding_heads(inputs, weights):
    """inputs: (B, T) int ids; weights: (n_head, vocab, n_embd).

    Returns a tuple of n_head arrays of shape (B, T, n_embd).
    """
    n_head, vocab, n_embd = weights.shape
    B, T = inputs.shape
    N = B * T

    # Token-major table layout: row r = concat over heads of embed[h].weight[r], so one
    # gathered row per token carries every head's embedding.
    # TODO(synk): in a real model, store the parameter in this layout to skip the transpose.
    w2d = jnp.transpose(weights, (1, 0, 2)).reshape(vocab, n_head * n_embd)
    ids = inputs.reshape(N).astype(jnp.int32)

    table_bytes = vocab * n_head * n_embd * weights.dtype.itemsize
    if table_bytes <= _VMEM_TABLE_LIMIT:
        slab = _gather_rows_vmem(ids, w2d, N)     # VMEM-resident table, vector-load gather
    else:
        slab = _gather_rows_dma(ids, w2d)         # HBM->HBM DMA gather

    slab = slab.reshape(B, T, n_head, n_embd)
    # Per-head split; under jit of a full model these slices fuse into the consumers.
    return tuple(slab[:, :, h, :] for h in range(n_head))


def value_embedding_forward(inputs, weights):
    """Matches ValueEmbedding.forward: list of 2*n_head arrays of shape (B, T, n_embd)."""
    ve = list(_value_embedding_heads(inputs, weights))
    ve = ve + ve[::-1]   # mirrored half aliases the forward half (no copies)
    return ve


if __name__ == "__main__":
    # Small config consistent with the module: n_head tables of shape (vocab_size, n_embd).
    vocab_size = 64
    n_embd = 32
    n_head = 4
    B, T = 2, 8

    key = jax.random.PRNGKey(0)
    k_w, k_ids = jax.random.split(key)
    weights = jax.random.normal(k_w, (n_head, vocab_size, n_embd), dtype=jnp.float32)
    inputs = jax.random.randint(k_ids, (B, T), 0, vocab_size, dtype=jnp.int32)

    ve = value_embedding_forward(inputs, weights)
    jax.block_until_ready(ve)

    # Reference: pure-JAX gather matching PyTorch semantics.
    ref = [weights[h][inputs] for h in range(n_head)]
    ref = ref + ref[::-1]
    assert len(ve) == 2 * n_head
    for got, want in zip(ve, ref):
        assert got.shape == (B, T, n_embd)
        assert jnp.array_equal(got, want), "mismatch vs reference gather"
    # Mirrored half must alias (not copy) the forward half.
    for i in range(n_head):
        assert ve[n_head + i] is ve[n_head - 1 - i]

    # Also exercise the large-table HBM->HBM DMA-gather path on the same data.
    w2d = jnp.transpose(weights, (1, 0, 2)).reshape(vocab_size, n_head * n_embd)
    ids = inputs.reshape(-1).astype(jnp.int32)
    slab = _gather_rows_dma(ids, w2d)
    jax.block_until_ready(slab)
    assert jnp.array_equal(slab, w2d[ids]), "DMA-gather path mismatch"

    print("KERNEL_OK")
</pallas_src>

<mosaic_0001>
module attributes {stable_mosaic.version = 11 : i64} {
  func.func @kernel(%arg0: i32, %arg1: memref<16xi32, #tpu.memory_space<smem>>, %arg2: memref<64x128xf32, #tpu.memory_space<vmem>>, %arg3: memref<16x128xf32, #tpu.memory_space<vmem>>) attributes {dimension_semantics = [#tpu.dimension_semantics<parallel>], iteration_bounds = array<i64: 1>, scalar_prefetch = 1 : i64, scratch_operands = 0 : i64, tpu.core_type = #tpu.core_type<tc>, window_params = [{pipeline_mode = #tpu.pipeline_mode<synchronous>, transform_indices = @transform_0, window_bounds = array<i64: 64, 128>}, {transform_indices = @transform_1, window_bounds = array<i64: 16, 128>}]} {
    %c16_i32 = arith.constant 16 : i32
    %0 = arith.muli %arg0, %c16_i32 : i32
    %c0_i32 = arith.constant 0 : i32
    %c2_i32 = arith.constant 2 : i32
    %1 = arith.addi %c0_i32, %c2_i32 : i32
    %c1_i32 = arith.constant 1 : i32
    scf.for %arg4 = %c0_i32 to %1 step %c1_i32  : i32 {
      %c8_i32 = arith.constant 8 : i32
      %2 = arith.muli %arg4, %c8_i32 : i32
      %3 = arith.addi %0, %2 : i32
      %c0_i32_1 = arith.constant 0 : i32
      %4 = arith.addi %3, %c0_i32_1 : i32
      %5 = arith.index_cast %4 : i32 to index
      %6 = memref.load %arg1[%5] : memref<16xi32, #tpu.memory_space<smem>>
      %c0_i32_2 = arith.constant 0 : i32
      %7 = arith.maxsi %6, %c0_i32_2 : i32
      %c63_i32 = arith.constant 63 : i32
      %8 = arith.minsi %7, %c63_i32 : i32
      %9 = arith.index_cast %8 : i32 to index
      %c0 = arith.constant 0 : index
      %10 = vector.load %arg2[%9, %c0] : memref<64x128xf32, #tpu.memory_space<vmem>>, vector<1x128xf32>
      %c8_i32_3 = arith.constant 8 : i32
      %11 = arith.muli %arg4, %c8_i32_3 : i32
      %12 = arith.addi %0, %11 : i32
      %c1_i32_4 = arith.constant 1 : i32
      %13 = arith.addi %12, %c1_i32_4 : i32
      %14 = arith.index_cast %13 : i32 to index
      %15 = memref.load %arg1[%14] : memref<16xi32, #tpu.memory_space<smem>>
      %c0_i32_5 = arith.constant 0 : i32
      %16 = arith.maxsi %15, %c0_i32_5 : i32
      %c63_i32_6 = arith.constant 63 : i32
      %17 = arith.minsi %16, %c63_i32_6 : i32
      %18 = arith.index_cast %17 : i32 to index
      %c0_7 = arith.constant 0 : index
      %19 = vector.load %arg2[%18, %c0_7] : memref<64x128xf32, #tpu.memory_space<vmem>>, vector<1x128xf32>
      %c8_i32_8 = arith.constant 8 : i32
      %20 = arith.muli %arg4, %c8_i32_8 : i32
      %21 = arith.addi %0, %20 : i32
      %c2_i32_9 = arith.constant 2 : i32
      %22 = arith.addi %21, %c2_i32_9 : i32
      %23 = arith.index_cast %22 : i32 to index
      %24 = memref.load %arg1[%23] : memref<16xi32, #tpu.memory_space<smem>>
      %c0_i32_10 = arith.constant 0 : i32
      %25 = arith.maxsi %24, %c0_i32_10 : i32
      %c63_i32_11 = arith.constant 63 : i32
      %26 = arith.minsi %25, %c63_i32_11 : i32
      %27 = arith.index_cast %26 : i32 to index
      %c0_12 = arith.constant 0 : index
      %28 = vector.load %arg2[%27, %c0_12] : memref<64x128xf32, #tpu.memory_space<vmem>>, vector<1x128xf32>
      %c8_i32_13 = arith.constant 8 : i32
      %29 = arith.muli %arg4, %c8_i32_13 : i32
      %30 = arith.addi %0, %29 : i32
      %c3_i32 = arith.constant 3 : i32
      %31 = arith.addi %30, %c3_i32 : i32
      %32 = arith.index_cast %31 : i32 to index
      %33 = memref.load %arg1[%32] : memref<16xi32, #tpu.memory_space<smem>>
      %c0_i32_14 = arith.constant 0 : i32
      %34 = arith.maxsi %33, %c0_i32_14 : i32
      %c63_i32_15 = arith.constant 63 : i32
      %35 = arith.minsi %34, %c63_i32_15 : i32
      %36 = arith.index_cast %35 : i32 to index
      %c0_16 = arith.constant 0 : index
      %37 = vector.load %arg2[%36, %c0_16] : memref<64x128xf32, #tpu.memory_space<vmem>>, vector<1x128xf32>
      %c8_i32_17 = arith.constant 8 : i32
      %38 = arith.muli %arg4, %c8_i32_17 : i32
      %39 = arith.addi %0, %38 : i32
      %c4_i32 = arith.constant 4 : i32
      %40 = arith.addi %39, %c4_i32 : i32
      %41 = arith.index_cast %40 : i32 to index
      %42 = memref.load %arg1[%41] : memref<16xi32, #tpu.memory_space<smem>>
      %c0_i32_18 = arith.constant 0 : i32
      %43 = arith.maxsi %42, %c0_i32_18 : i32
      %c63_i32_19 = arith.constant 63 : i32
      %44 = arith.minsi %43, %c63_i32_19 : i32
      %45 = arith.index_cast %44 : i32 to index
      %c0_20 = arith.constant 0 : index
      %46 = vector.load %arg2[%45, %c0_20] : memref<64x128xf32, #tpu.memory_space<vmem>>, vector<1x128xf32>
      %c8_i32_21 = arith.constant 8 : i32
      %47 = arith.muli %arg4, %c8_i32_21 : i32
      %48 = arith.addi %0, %47 : i32
      %c5_i32 = arith.constant 5 : i32
      %49 = arith.addi %48, %c5_i32 : i32
      %50 = arith.index_cast %49 : i32 to index
      %51 = memref.load %arg1[%50] : memref<16xi32, #tpu.memory_space<smem>>
      %c0_i32_22 = arith.constant 0 : i32
      %52 = arith.maxsi %51, %c0_i32_22 : i32
      %c63_i32_23 = arith.constant 63 : i32
      %53 = arith.minsi %52, %c63_i32_23 : i32
      %54 = arith.index_cast %53 : i32 to index
      %c0_24 = arith.constant 0 : index
      %55 = vector.load %arg2[%54, %c0_24] : memref<64x128xf32, #tpu.memory_space<vmem>>, vector<1x128xf32>
      %c8_i32_25 = arith.constant 8 : i32
      %56 = arith.muli %arg4, %c8_i32_25 : i32
      %57 = arith.addi %0, %56 : i32
      %c6_i32 = arith.constant 6 : i32
      %58 = arith.addi %57, %c6_i32 : i32
      %59 = arith.index_cast %58 : i32 to index
      %60 = memref.load %arg1[%59] : memref<16xi32, #tpu.memory_space<smem>>
      %c0_i32_26 = arith.constant 0 : i32
      %61 = arith.maxsi %60, %c0_i32_26 : i32
      %c63_i32_27 = arith.constant 63 : i32
      %62 = arith.minsi %61, %c63_i32_27 : i32
      %63 = arith.index_cast %62 : i32 to index
      %c0_28 = arith.constant 0 : index
      %64 = vector.load %arg2[%63, %c0_28] : memref<64x128xf32, #tpu.memory_space<vmem>>, vector<1x128xf32>
      %c8_i32_29 = arith.constant 8 : i32
      %65 = arith.muli %arg4, %c8_i32_29 : i32
      %66 = arith.addi %0, %65 : i32
      %c7_i32 = arith.constant 7 : i32
      %67 = arith.addi %66, %c7_i32 : i32
      %68 = arith.index_cast %67 : i32 to index
      %69 = memref.load %arg1[%68] : memref<16xi32, #tpu.memory_space<smem>>
      %c0_i32_30 = arith.constant 0 : i32
      %70 = arith.maxsi %69, %c0_i32_30 : i32
      %c63_i32_31 = arith.constant 63 : i32
      %71 = arith.minsi %70, %c63_i32_31 : i32
      %72 = arith.index_cast %71 : i32 to index
      %c0_32 = arith.constant 0 : index
      %73 = vector.load %arg2[%72, %c0_32] : memref<64x128xf32, #tpu.memory_space<vmem>>, vector<1x128xf32>
      %c8_i32_33 = arith.constant 8 : i32
      %74 = arith.muli %arg4, %c8_i32_33 : i32
      %75 = tpu.assume_multiple %74, 8 : i32
      %76 = tpu.concatenate %10, %19, %28, %37, %46, %55, %64, %73 in 0 : vector<1x128xf32>, vector<1x128xf32>, vector<1x128xf32>, vector<1x128xf32>, vector<1x128xf32>, vector<1x128xf32>, vector<1x128xf32>, vector<1x128xf32> -> vector<8x128xf32>
      %77 = arith.index_cast %75 : i32 to index
      %c0_34 = arith.constant 0 : index
      %78 = vector.load %arg3[%77, %c0_34] : memref<16x128xf32, #tpu.memory_space<vmem>>, vector<8x128xf32>
      tpu.vector_store %arg3[%77, %c0_34], %76 {strides = array<i32>} : memref<16x128xf32, #tpu.memory_space<vmem>>, vector<8x128xf32>,
    }
    %c2_i32_0 = arith.constant 2 : i32
    return
  }
  func.func @transform_0(%arg0: i32, %arg1: memref<16xi32, #tpu.memory_space<smem>>) -> (i32, i32) {
    %c0_i32 = arith.constant 0 : i32
    %c0_i32_0 = arith.constant 0 : i32
    %c0_i32_1 = arith.constant 0 : i32
    return %c0_i32, %c0_i32_0 : i32, i32
  }
  func.func @transform_1(%arg0: i32, %arg1: memref<16xi32, #tpu.memory_space<smem>>) -> (i32, i32) {
    %c0_i32 = arith.constant 0 : i32
    %c0_i32_0 = arith.constant 0 : i32
    return %arg0, %c0_i32 : i32, i32
  }
}

</mosaic_0001>

<bundles_post_ra>
// kernel: _value_embedding_heads.1
= control target key start
LH: loop header
LB: loop body
LE: loop exit
PB: predicated region body
PF: predicated region fallthrough
CT: control target
= control target key end

     0   :  { %s309_s0 = inlined_call_operand.vmem [shape: s32[16], index: 0, kind: input, shape index: {}]   ;;  %s310_s1 = inlined_call_operand.vmem [shape: f32[64,128], index: 1, kind: input, shape index: {}]   ;;  %s311_s2 = inlined_call_operand.vmem [shape: f32[16,128], index: 2, kind: output, shape index: {}]  }
   0x1   :  { %s7_s11 = sshll.u32 %s309_s0, 4  ;;  %s8_s11 = int_to_ptr.vmem [resolvable:$true] %s7_s11 }
   0x2   :  { %s209_s12 = scalar_lea.vmem %s8_s11, 16  ;;  %p214_p1 = scmp.lt.s32.totalorder %s8_s11, %s8_s11 }
   0x3   :  { %p210_p0 = scmp.ne.s32.totalorder %s8_s11, %s209_s12  ;;  %p215_p2 = scmp.lt.s32.totalorder %s209_s12, %s209_s12 }
   0x5   :  { %p216_p3 = por %p215_p2, %p214_p1 }
   0x7   :  { %p217_p4 = pnand %p216_p3, %p210_p0 }
   0x9   :  { %220 = shalt.err (!%p217_p4)  }
   0xa   :  { %s231_s13 = smov [#allocation3]  }
   0xb   :  { %10 = dma.vmem_to_smem %s8_s11, 16, %s231_s13, [#allocation2] }
   0xc   :  { %225 = dma.done.wait [#allocation2], 16 }
   0xd   :  { %226 = vsyncadd [#allocation2], 4294967280 }
   0xe   :  { %12 = sfence }
   0xf   :  { %s250_s14 = smov 0  }
  0x10 LB: > { %s256_s0 = sshll.u32 %s229_s14, 3  ;;  %vm108_vm0 = vcmask 1040384   ;;  %vm110_vm1 = vcmask 1041408   ;;  %vm112_vm2 = vcmask 1042432   ;;  %vm114_vm3 = vcmask 1043456   ;;  %s21_s14 = sadd.s32 1, %s229_s14   ;;  %s229_s14 = sphi %s250_s14, %s21_s14  }
  0x11   : > { %s24_s15 = sld [smem:[#allocation3 + %s256_s0]]  ;;  %s31_s16 = sadd.s32 1, %s256_s0  ;;  %vm116_vm4 = vcmask 1044480   ;;  %vm118_vm5 = vcmask 1045504   ;;  %vm120_vm6 = vcmask 1046528  }
  0x12   : > { %s32_s17 = sld [smem:[#allocation3 + %s31_s16]]  ;;  %s39_s18 = sadd.s32 2, %s256_s0 }
  0x13   : > { %s40_s19 = sld [smem:[#allocation3 + %s39_s18]]  ;;  %s47_s20 = sadd.s32 3, %s256_s0 }
  0x14   : > { %s48_s21 = sld [smem:[#allocation3 + %s47_s20]]  ;;  %s55_s22 = sadd.s32 4, %s256_s0 }
  0x15   : > { %s263_s23 = sld [smem:[#allocation3 + %s55_s22]]  ;;  %s63_s24 = sadd.s32 5, %s256_s0 }
  0x16   : > { %s266_s25 = sld [smem:[#allocation3 + %s63_s24]]  ;;  %s71_s26 = sadd.s32 6, %s256_s0 }
  0x17   : > { %p25_p5 = scmp.gt.s32.totalorder %s24_s15, 0  ;;  %p144_p6 = scmp.lt.s32.totalorder %s24_s15, 63 }
  0x18   : > { %p33_p7 = scmp.gt.s32.totalorder %s32_s17, 0  ;;  %p149_p8 = scmp.lt.s32.totalorder %s32_s17, 63 }
  0x19   : > { %s313_s15 = smov (!%p25_p5, %s24_s15), 0  ;;  %p41_p9 = scmp.gt.s32.totalorder %s40_s19, 0 }
  0x1a   : > { %s315_s17 = smov (!%p33_p7, %s32_s17), 0  ;;  %s317_s15 = smov (!%p144_p6, %s313_s15), 63 }
  0x1b   : > { %s319_s17 = smov (!%p149_p8, %s315_s17), 63  ;;  %s29_s29 = scalar_lea.vmem %s310_s1, %s317_s15 }
  0x1c   : > { %s37_s4 = scalar_lea.vmem %s310_s1, %s319_s17  ;;  %p154_p10 = scmp.lt.s32.totalorder %s40_s19, 63  ;;  %v30_v3 = vld [vmem:[%s29_s29] sm:$0x1] }
  0x1d   : > { %s321_s19 = smov (!%p41_p9, %s40_s19), 0  ;;  %p49_p11 = scmp.gt.s32.totalorder %s48_s21, 0  ;;  %v38_v0 = vld [vmem:[%s37_s4] sm:$0x1] }
  0x1e   : > { %p159_p12 = scmp.lt.s32.totalorder %s48_s21, 63  ;;  %s323_s19 = smov (!%p154_p10, %s321_s19), 63  ;;  %v88_v2 = vrot.slane %v38_v0, 7 }
  0x1f   : > { %s325_s21 = smov (!%p49_p11, %s48_s21), 0  ;;  %s45_s7 = scalar_lea.vmem %s310_s1, %s323_s19 }
  0x20   : > { %p57_p13 = scmp.gt.s32.totalorder %s263_s23, 0  ;;  %s327_s21 = smov (!%p159_p12, %s325_s21), 63  ;;  %v46_v1 = vld [vmem:[%s45_s7] sm:$0x1]  ;;  %v109_v6 = vsel %vm108_vm0, %v30_v3, %v88_v2 }
  0x21   : > { %s53_s11 = scalar_lea.vmem %s310_s1, %s327_s21  ;;  %p164_p0 = scmp.lt.s32.totalorder %s263_s23, 63  ;;  %v91_v5 = vrot.slane %v46_v1, 6 }
  0x22   : > { %s58_s8 = scalar_select %p57_p13, %s263_s23, 0  ;;  %v54_v4 = vld [vmem:[%s53_s11] sm:$0x1] }
  0x23   : > { %p65_p1 = scmp.gt.s32.totalorder %s266_s25, 0  ;;  %p169_p2 = scmp.lt.s32.totalorder %s266_s25, 63  ;;  %v94_v8 = vrot.slane %v54_v4, 5  ;;  %v111_v9 = vsel %vm110_vm1, %v109_v6, %v91_v5 }
  0x24   : > { %s329_s8 = smov (!%p164_p0, %s58_s8), 63  ;;  %s72_s16 = sld [smem:[#allocation3 + %s71_s26]] }
  0x25   : > { %s331_s25 = smov (!%p65_p1, %s266_s25), 0  ;;  %s61_s15 = scalar_lea.vmem %s310_s1, %s329_s8  ;;  %v113_v12 = vsel %vm112_vm2, %v111_v9, %v94_v8 }
  0x26   : > { %s333_s25 = smov (!%p169_p2, %s331_s25), 63  ;;  %s79_s17 = sadd.s32 7, %s256_s0  ;;  %v62_v7 = vld [vmem:[%s61_s15] sm:$0x1] }
  0x27   : > { %s69_s20 = scalar_lea.vmem %s310_s1, %s333_s25  ;;  %s80_s21 = sld [smem:[#allocation3 + %s79_s17]]  ;;  %v97_v11 = vrot.slane %v62_v7, 4 }
  0x28   : > { %v70_v10 = vld [vmem:[%s69_s20] sm:$0x1]  ;;  %s122_s30 = scalar_lea.vmem %s311_s2, %s256_s0  ;;  %p18_p7 = scmp.ge.s32.totalorder %s21_s14, 2  }
  0x29   : > { %v100_v13 = vrot.slane %v70_v10, 3  ;;  %v115_v14 = vsel %vm114_vm3, %v113_v12, %v97_v11 }
  0x2a   : > { %p73_p3 = scmp.gt.s32.totalorder %s72_s16, 0  ;;  %p174_p4 = scmp.lt.s32.totalorder %s72_s16, 63 }
  0x2b   : > { %v117_v16 = vsel %vm116_vm4, %v115_v14, %v100_v13 }
  0x2c   : > { %s335_s16 = smov (!%p73_p3, %s72_s16), 0 }
  0x2d   : > { %p81_p5 = scmp.gt.s32.totalorder %s80_s21, 0  ;;  %p179_p6 = scmp.lt.s32.totalorder %s80_s21, 63 }
  0x2e   : > { %s337_s16 = smov (!%p174_p4, %s335_s16), 63 }
  0x2f   : > { %s339_s21 = smov (!%p81_p5, %s80_s21), 0  ;;  %s77_s24 = scalar_lea.vmem %s310_s1, %s337_s16 }
  0x30   : > { %v78_v15 = vld [vmem:[%s77_s24] sm:$0x1]  ;;  %s341_s21 = smov (!%p179_p6, %s339_s21), 63  ;;  %20 = sbr.rel (!%p18_p7) target bundleno = 16 (0x10), region = 40 }
  0x31   : > { %v103_v17 = vrot.slane %v78_v15, 2  ;;  %s85_s27 = scalar_lea.vmem %s310_s1, %s341_s21 }
  0x32   : > { %v86_v18 = vld [vmem:[%s85_s27] sm:$0x1] }
  0x33   : > { %v119_v19 = vsel %vm118_vm5, %v117_v16, %v103_v17  ;;  %v106_v20 = vrot.slane %v86_v18, 1 }
  0x35   : > { %v121_v21 = vsel %vm120_vm6, %v119_v19, %v106_v20 }
  0x36   : > { %123 = vst [vmem:[%s122_s30] sm:$0xff] %v121_v21 }

</bundles_post_ra>
